<compile_context>
chip_gen: v7x
topology: tpu7x:2x2x1
jax: 0.10.0
libtpu: 0.0.40
codegen_flags: <defaults>
</compile_context>

<pallas_src>
import functools
import math

import numpy as np
import jax
import jax.numpy as jnp
from jax.experimental import pallas as pl
from jax.experimental.pallas import tpu as pltpu

P = 128  # lane-dense padded feature width shared by every fused layer


# ----------------------------- Pallas kernel --------------------------------
def _fused_forward_kernel(x_ref, w_ref, b_ref, o_ref, *, n_layers):
    """Fused MLP-style chain: a <- relu(a @ W_i + b_i) (no relu on the last).

    x_ref: (TB, P) f32          lane-padded, channel-major-flattened input tile
    w_ref: (n_layers, P, P)     stacked dense layer matrices (bf16 or f32);
                                conv layers Toeplitz-folded, branches block-diag
    b_ref: (n_layers, 1, P) f32 stacked biases
    o_ref: (TB, 1) f32          final output (true value lives in lane 0)
    """
    a = x_ref[...]                                            # (TB, P) f32
    for i in range(n_layers):                                 # static unroll
        if i > 0:
            a = jnp.maximum(a, 0.0)                           # ReLU (not after last)
        w = w_ref[i]                                          # (P, P), weight dtype
        a = jnp.dot(a.astype(w.dtype), w,
                    preferred_element_type=jnp.float32) + b_ref[i]
    o_ref[...] = a[:, :1].astype(o_ref.dtype)


def fused_forward(x_flat, w_stack, b_stack, *, n_layers, block_tb):
    """x_flat: (B_pad, P) f32; w_stack: (n_layers, P, P); b_stack: (n_layers, 1, P)."""
    B = x_flat.shape[0]
    assert B % block_tb == 0
    kernel = functools.partial(_fused_forward_kernel, n_layers=n_layers)
    flops = int(2 * B * P * P * n_layers)
    bytes_accessed = int(
        x_flat.size * np.dtype(x_flat.dtype).itemsize
        + w_stack.size * np.dtype(w_stack.dtype).itemsize
        + b_stack.size * np.dtype(b_stack.dtype).itemsize
        + B * 4)
    return pl.pallas_call(
        kernel,
        grid=(B // block_tb,),
        out_shape=jax.ShapeDtypeStruct((B, 1), jnp.float32),
        in_specs=[
            pl.BlockSpec((block_tb, P), lambda i: (i, 0)),
            # constant index_map -> weight/bias stacks stay VMEM-resident
            pl.BlockSpec((n_layers, P, P), lambda i: (0, 0, 0)),
            pl.BlockSpec((n_layers, 1, P), lambda i: (0, 0, 0)),
        ],
        out_specs=pl.BlockSpec((block_tb, 1), lambda i: (i, 0)),
        compiler_params=pltpu.CompilerParams(dimension_semantics=("parallel",)),
        cost_estimate=pl.CostEstimate(
            flops=flops, transcendentals=0, bytes_accessed=bytes_accessed),
    )(x_flat, w_stack, b_stack)


# ----------------- fold conv structure into dense layer stack ----------------
def _conv1d_to_dense(w, b, stride, L_in):
    """Dense (Toeplitz) matrix of a Conv1d acting on a channel-major flat input.

    out_flat[co*L_out + lo] = b[co] + sum_{ci,k} in_flat[ci*L_in + lo*stride + k] * w[co,ci,k]
    """
    w = np.asarray(w, np.float32)
    b = np.asarray(b, np.float32)
    C_out, C_in, K = w.shape
    L_out = (L_in - K) // stride + 1
    M = np.zeros((C_in * L_in, C_out * L_out), np.float32)
    for co in range(C_out):
        for ci in range(C_in):
            for lo in range(L_out):
                r = ci * L_in + lo * stride
                M[r:r + K, co * L_out + lo] = w[co, ci, :]
    bias = np.repeat(b, L_out)                      # bias[co*L_out + lo] = b[co]
    return M, bias, L_out


def _block_diag(a, b):
    r1, c1 = a.shape
    r2, c2 = b.shape
    out = np.zeros((r1 + r2, c1 + c2), np.float32)
    out[:r1, :c1] = a
    out[r1:, c1:] = b
    return out


def build_fused_layers(params, *, L, f, w_dtype=jnp.bfloat16):
    """One-time prep: fold both conv branches + MLP into a (n_layers, P, P) stack."""
    layers = []
    L_cur = L
    for (w1, b1, s1), (w2, b2, s2) in zip(params["conv1"], params["conv2"]):
        M1, v1, L_out = _conv1d_to_dense(w1, b1, s1, L_cur)
        M2, v2, _ = _conv1d_to_dense(w2, b2, s2, L_cur)
        layers.append((_block_diag(M1, M2), np.concatenate([v1, v2])))
        L_cur = L_out
    C_last = int(params["conv1"][-1][0].shape[0])
    # torch's `x.view(-1, f)` + `cat` matches this flat layout only when the
    # final conv length is 1 (true for the reference config); other configs
    # would need a different flatten/concat permutation here.
    assert L_cur == 1 and C_last == f, (L_cur, C_last, f)
    for (w, b) in params["lin"]:
        layers.append((np.asarray(w, np.float32), np.asarray(b, np.float32)))

    n_layers = len(layers)
    W = np.zeros((n_layers, P, P), np.float32)
    Bv = np.zeros((n_layers, 1, P), np.float32)
    for i, (M, v) in enumerate(layers):
        assert M.shape[0] <= P and M.shape[1] <= P, M.shape
        W[i, : M.shape[0], : M.shape[1]] = M
        Bv[i, 0, : v.shape[0]] = v
    return jnp.asarray(W, dtype=w_dtype), jnp.asarray(Bv, dtype=jnp.float32), n_layers


# -------------------------------- forward -----------------------------------
def _round_up(n, m):
    return -(-n // m) * m


def cnn10_forward(x, w_stack, b_stack, *, n_layers, block_b=256):
    """x: (B, n_inputs, L) f32 -> (B, 1) f32."""
    B = x.shape[0]
    flat = x.reshape(B, -1).astype(jnp.float32)      # (B, n_inputs*L), channel-major
    assert flat.shape[1] <= P, flat.shape
    # Uniform lane-dense width: pad features to P so layer 0 is (TB,128)@(128,128).
    # Batch is padded to the tile size; padded rows are discarded after the call.
    TB = block_b if B >= block_b else _round_up(B, 8)
    B_pad = _round_up(B, TB)
    flat = jnp.pad(flat, ((0, B_pad - B), (0, P - flat.shape[1])))
    out = fused_forward(flat, w_stack, b_stack, n_layers=n_layers, block_tb=TB)
    return out[:B]


# --------------------------- parameter construction --------------------------
def _uniform(key, shape, bound):
    return jax.random.uniform(key, shape, jnp.float32, minval=-bound, maxval=bound)


def init_cnn10_params(key, c, f0, conv_specs, lin_sizes):
    """Mimics torch default init (U(-1/sqrt(fan_in), 1/sqrt(fan_in)))."""
    params = {"conv1": [], "conv2": [], "lin": []}
    fin, fout = c, f0
    for (k, s) in conv_specs:
        for branch in ("conv1", "conv2"):
            key, kw, kb = jax.random.split(key, 3)
            bound = 1.0 / math.sqrt(fin * k)
            params[branch].append((_uniform(kw, (fout, fin, k), bound),
                                   _uniform(kb, (fout,), bound), s))
        fin, fout = fout, fout * 2
    f = fin
    n1 = 2 * f
    for n2 in list(lin_sizes) + [1]:
        key, kw, kb = jax.random.split(key, 3)
        bound = 1.0 / math.sqrt(n1)
        # stored pre-transposed: (in, out) == torch W.T
        params["lin"].append((_uniform(kw, (n1, n2), bound),
                              _uniform(kb, (n2,), bound)))
        n1 = n2
    return params, f


# --------------------------- plain-JAX reference -----------------------------
def _ref_conv1d(x, w, b, s):
    B, C, L = x.shape
    C_out, _, K = w.shape
    L_out = (L - K) // s + 1
    idx = (jnp.arange(L_out) * s)[:, None] + jnp.arange(K)[None, :]
    patches = x[:, :, idx]                                   # (B, C, L_out, K)
    return jnp.einsum("bclk,ock->bol", patches, w) + b[None, :, None]


def reference_forward(params, x, c, f):
    x1, x2 = x[:, :c, :], x[:, c:, :]
    for (w, b, s) in params["conv1"]:
        x1 = jax.nn.relu(_ref_conv1d(x1, w, b, s))
    for (w, b, s) in params["conv2"]:
        x2 = jax.nn.relu(_ref_conv1d(x2, w, b, s))
    h = jnp.concatenate([x1.reshape(-1, f), x2.reshape(-1, f)], axis=1)
    lins = params["lin"]
    for i, (w, b) in enumerate(lins):
        h = h @ w + b
        if i + 1 < len(lins):
            h = jax.nn.relu(h)
    return h


# --------------------------------- main --------------------------------------
if __name__ == "__main__":
    # cfg analogue: batch_size=2, n_inputs=8, cnn=[(8, 8), (4, 2), (3, 1), 16]
    B, n_inputs, seq = 2, 8, 8
    c = n_inputs // 2                       # 4 channels per branch
    f0 = 8                                  # first conv out_channels
    conv_specs = [(4, 2), (3, 1)]           # (kernel, stride); L: 8 -> 3 -> 1
    lin_sizes = [16]                        # Linear(32,16) then Linear(16,1)

    key = jax.random.PRNGKey(0)
    key_x, key_p = jax.random.split(key)
    x = jax.random.normal(key_x, (B, n_inputs, seq), jnp.float32)

    params, f = init_cnn10_params(key_p, c, f0, conv_specs, lin_sizes)
    assert f == 16

    # One-time weight preprocessing (outside the per-forward hot path).
    W32, Bv, n_layers = build_fused_layers(params, L=seq, f=f, w_dtype=jnp.float32)
    Wbf, _, _ = build_fused_layers(params, L=seq, f=f, w_dtype=jnp.bfloat16)

    ref = jax.block_until_ready(reference_forward(params, x, c, f))
    fwd = jax.jit(functools.partial(cnn10_forward, n_layers=n_layers))

    # Tight structural check with f32 weights (validates Toeplitz fold + kernel).
    out32 = jax.block_until_ready(fwd(x, W32, Bv))
    assert out32.shape == (B, 1) and out32.dtype == jnp.float32
    np.testing.assert_allclose(np.asarray(out32), np.asarray(ref),
                               rtol=1e-4, atol=1e-4)

    # Production path: bf16 weights, bf16 matmul inputs, f32 accumulate.
    outbf = jax.block_until_ready(fwd(x, Wbf, Bv))
    assert outbf.shape == (B, 1) and outbf.dtype == jnp.float32
    np.testing.assert_allclose(np.asarray(outbf), np.asarray(ref),
                               rtol=2e-2, atol=2e-2)

    print("KERNEL_OK")
</pallas_src>

<mosaic_0001>
module attributes {stable_mosaic.version = 11 : i64} {
  func.func @_fused_forward_kernel(%arg0: i32, %arg1: memref<8x128xf32, #tpu.memory_space<vmem>>, %arg2: memref<4x128x128xf32, #tpu.memory_space<vmem>>, %arg3: memref<4x1x128xf32, #tpu.memory_space<vmem>>, %arg4: memref<8x1xf32, #tpu.memory_space<vmem>>) attributes {dimension_semantics = [#tpu.dimension_semantics<parallel>], iteration_bounds = array<i64: 1>, scalar_prefetch = 0 : i64, scratch_operands = 0 : i64, tpu.core_type = #tpu.core_type<tc>, window_params = [{transform_indices = @transform_0, window_bounds = array<i64: 8, 128>}, {pipeline_mode = #tpu.pipeline_mode<synchronous>, transform_indices = @transform_1, window_bounds = array<i64: 4, 128, 128>}, {pipeline_mode = #tpu.pipeline_mode<synchronous>, transform_indices = @transform_2, window_bounds = array<i64: 4, 1, 128>}, {transform_indices = @transform_3, window_bounds = array<i64: 8, 1>}]} {
    %c0 = arith.constant 0 : index
    %c0_0 = arith.constant 0 : index
    %0 = vector.load %arg1[%c0, %c0_0] : memref<8x128xf32, #tpu.memory_space<vmem>>, vector<8x128xf32>
    %c0_1 = arith.constant 0 : index
    %c0_2 = arith.constant 0 : index
    %c0_3 = arith.constant 0 : index
    %1 = vector.load %arg2[%c0_1, %c0_2, %c0_3] : memref<4x128x128xf32, #tpu.memory_space<vmem>>, vector<1x128x128xf32>
    %2 = vector.shape_cast %1 : vector<1x128x128xf32> to vector<128x128xf32>
    %cst = arith.constant dense<0.000000e+00> : vector<8x128xf32>
    %3 = tpu.matmul %0, %2, %cst {dimension_numbers = #tpu.dot_dimension_numbers<[1], [0], [0], [1], [0, 0, 1, 1], [], []>} : vector<8x128xf32>, vector<128x128xf32>, vector<8x128xf32> -> vector<8x128xf32>
    %c0_4 = arith.constant 0 : index
    %c0_5 = arith.constant 0 : index
    %c0_6 = arith.constant 0 : index
    %4 = vector.load %arg3[%c0_4, %c0_5, %c0_6] : memref<4x1x128xf32, #tpu.memory_space<vmem>>, vector<1x1x128xf32>
    %5 = vector.shape_cast %4 : vector<1x1x128xf32> to vector<1x128xf32>
    %6 = vector.broadcast %5 : vector<1x128xf32> to vector<8x128xf32>
    %7 = arith.addf %3, %6 : vector<8x128xf32>
    %cst_7 = arith.constant 0.000000e+00 : f32
    %8 = vector.broadcast %cst_7 : f32 to vector<8x128xf32>
    %9 = arith.maximumf %7, %8 : vector<8x128xf32>
    %c1 = arith.constant 1 : index
    %c0_8 = arith.constant 0 : index
    %c0_9 = arith.constant 0 : index
    %10 = vector.load %arg2[%c1, %c0_8, %c0_9] : memref<4x128x128xf32, #tpu.memory_space<vmem>>, vector<1x128x128xf32>
    %11 = vector.shape_cast %10 : vector<1x128x128xf32> to vector<128x128xf32>
    %cst_10 = arith.constant dense<0.000000e+00> : vector<8x128xf32>
    %12 = tpu.matmul %9, %11, %cst_10 {dimension_numbers = #tpu.dot_dimension_numbers<[1], [0], [0], [1], [0, 0, 1, 1], [], []>} : vector<8x128xf32>, vector<128x128xf32>, vector<8x128xf32> -> vector<8x128xf32>
    %c1_11 = arith.constant 1 : index
    %c0_12 = arith.constant 0 : index
    %c0_13 = arith.constant 0 : index
    %13 = vector.load %arg3[%c1_11, %c0_12, %c0_13] : memref<4x1x128xf32, #tpu.memory_space<vmem>>, vector<1x1x128xf32>
    %14 = vector.shape_cast %13 : vector<1x1x128xf32> to vector<1x128xf32>
    %15 = vector.broadcast %14 : vector<1x128xf32> to vector<8x128xf32>
    %16 = arith.addf %12, %15 : vector<8x128xf32>
    %cst_14 = arith.constant 0.000000e+00 : f32
    %17 = vector.broadcast %cst_14 : f32 to vector<8x128xf32>
    %18 = arith.maximumf %16, %17 : vector<8x128xf32>
    %c2 = arith.constant 2 : index
    %c0_15 = arith.constant 0 : index
    %c0_16 = arith.constant 0 : index
    %19 = vector.load %arg2[%c2, %c0_15, %c0_16] : memref<4x128x128xf32, #tpu.memory_space<vmem>>, vector<1x128x128xf32>
    %20 = vector.shape_cast %19 : vector<1x128x128xf32> to vector<128x128xf32>
    %cst_17 = arith.constant dense<0.000000e+00> : vector<8x128xf32>
    %21 = tpu.matmul %18, %20, %cst_17 {dimension_numbers = #tpu.dot_dimension_numbers<[1], [0], [0], [1], [0, 0, 1, 1], [], []>} : vector<8x128xf32>, vector<128x128xf32>, vector<8x128xf32> -> vector<8x128xf32>
    %c2_18 = arith.constant 2 : index
    %c0_19 = arith.constant 0 : index
    %c0_20 = arith.constant 0 : index
    %22 = vector.load %arg3[%c2_18, %c0_19, %c0_20] : memref<4x1x128xf32, #tpu.memory_space<vmem>>, vector<1x1x128xf32>
    %23 = vector.shape_cast %22 : vector<1x1x128xf32> to vector<1x128xf32>
    %24 = vector.broadcast %23 : vector<1x128xf32> to vector<8x128xf32>
    %25 = arith.addf %21, %24 : vector<8x128xf32>
    %cst_21 = arith.constant 0.000000e+00 : f32
    %26 = vector.broadcast %cst_21 : f32 to vector<8x128xf32>
    %27 = arith.maximumf %25, %26 : vector<8x128xf32>
    %c3 = arith.constant 3 : index
    %c0_22 = arith.constant 0 : index
    %c0_23 = arith.constant 0 : index
    %28 = vector.load %arg2[%c3, %c0_22, %c0_23] : memref<4x128x128xf32, #tpu.memory_space<vmem>>, vector<1x128x128xf32>
    %29 = vector.shape_cast %28 : vector<1x128x128xf32> to vector<128x128xf32>
    %cst_24 = arith.constant dense<0.000000e+00> : vector<8x128xf32>
    %30 = tpu.matmul %27, %29, %cst_24 {dimension_numbers = #tpu.dot_dimension_numbers<[1], [0], [0], [1], [0, 0, 1, 1], [], []>} : vector<8x128xf32>, vector<128x128xf32>, vector<8x128xf32> -> vector<8x128xf32>
    %c3_25 = arith.constant 3 : index
    %c0_26 = arith.constant 0 : index
    %c0_27 = arith.constant 0 : index
    %31 = vector.load %arg3[%c3_25, %c0_26, %c0_27] : memref<4x1x128xf32, #tpu.memory_space<vmem>>, vector<1x1x128xf32>
    %32 = vector.shape_cast %31 : vector<1x1x128xf32> to vector<1x128xf32>
    %33 = vector.broadcast %32 : vector<1x128xf32> to vector<8x128xf32>
    %34 = arith.addf %30, %33 : vector<8x128xf32>
    %35 = vector.extract_strided_slice %34 {offsets = [0, 0], sizes = [8, 1], strides = [1, 1]} : vector<8x128xf32> to vector<8x1xf32>
    %c0_28 = arith.constant 0 : index
    %c0_29 = arith.constant 0 : index
    %36 = vector.load %arg4[%c0_28, %c0_29] : memref<8x1xf32, #tpu.memory_space<vmem>>, vector<8x1xf32>
    tpu.vector_store %arg4[%c0_28, %c0_29], %35 {strides = array<i32>} : memref<8x1xf32, #tpu.memory_space<vmem>>, vector<8x1xf32>,
    return
  }
  func.func @transform_0(%arg0: i32) -> (i32, i32) {
    %c0_i32 = arith.constant 0 : i32
    %c0_i32_0 = arith.constant 0 : i32
    return %arg0, %c0_i32 : i32, i32
  }
  func.func @transform_1(%arg0: i32) -> (i32, i32, i32) {
    %c0_i32 = arith.constant 0 : i32
    %c0_i32_0 = arith.constant 0 : i32
    %c0_i32_1 = arith.constant 0 : i32
    %c0_i32_2 = arith.constant 0 : i32
    return %c0_i32, %c0_i32_0, %c0_i32_1 : i32, i32, i32
  }
  func.func @transform_2(%arg0: i32) -> (i32, i32, i32) {
    %c0_i32 = arith.constant 0 : i32
    %c0_i32_0 = arith.constant 0 : i32
    %c0_i32_1 = arith.constant 0 : i32
    %c0_i32_2 = arith.constant 0 : i32
    return %c0_i32, %c0_i32_0, %c0_i32_1 : i32, i32, i32
  }
  func.func @transform_3(%arg0: i32) -> (i32, i32) {
    %c0_i32 = arith.constant 0 : i32
    %c0_i32_0 = arith.constant 0 : i32
    return %arg0, %c0_i32 : i32, i32
  }
}

</mosaic_0001>

<bundles_post_ra>
// kernel: cnn10_forward.1
= control target key start
LH: loop header
LB: loop body
LE: loop exit
PB: predicated region body
PF: predicated region fallthrough
CT: control target
= control target key end

     0   :  { %8 = vsyncpa [#allocation3], 0  ;;  %s758_s12 = smov [#allocation2]   ;;  %s854_s0 = inlined_call_operand.vmem [shape: f32[8,128], index: 0, kind: input, shape index: {}]   ;;  %s855_s1 = inlined_call_operand.hbm [shape: f32[4,128,128], index: 1, kind: input, shape index: {}]   ;;  %s856_s2 = inlined_call_operand.vmem [shape: f32[4,1,128], index: 2, kind: input, shape index: {}]   ;;  %s857_s3 = inlined_call_operand.vmem [shape: f32[8,1], index: 3, kind: output, shape index: {}]  }
   0x1   :  { %s16_s13 = sshll.u32 %s758_s12, 4  ;;  %s734_s16 = scalar_lea.hbm %s855_s1, 8192  ;;  %s17_s13 = int_to_ptr.vmem [resolvable:$true] %s16_s13 }
   0x2   :  { %p735_p0 = scmp.ne.s32.totalorder %s855_s1, %s734_s16  ;;  %p738_p1 = scmp.lt.u32.totalorder %s734_s16, %s855_s1 }
   0x4   :  { %p740_p2 = pnand %p738_p1, %p735_p0 }
   0x6   :  { %743 = shalt.err (!%p740_p2)
}
   0x7   :  { %s744_s21 = scalar_lea.vmem %s17_s13, 8192  ;;  %p749_p4 = scmp.lt.s32.totalorder %s17_s13, %s17_s13 }
   0x8   :  { %p745_p3 = scmp.ne.s32.totalorder %s17_s13, %s744_s21  ;;  %p750_p5 = scmp.lt.s32.totalorder %s744_s21, %s744_s21 }
   0xa   :  { %p751_p6 = por %p750_p5, %p749_p4 }
   0xc   :  { %p752_p7 = pnand %p751_p6, %p745_p3 }
   0xe   :  { %755 = shalt.err (!%p752_p7)
}
   0xf   :  { %s759_s22 = smov 128   ;;  %s760_s23 = smov 8  }
  0x10   :  { %22 = dma.hbm_to_vmem [thread:$0]  %s855_s1, 8192, %s17_s13, [#allocation3], %s759_s22, %s759_s22, %s760_s23  }
  0x11   :  { %756 = dma.done.wait [#allocation3], 8192  }
  0x12   :  { %757 = vsyncadd [#allocation3], 4294959104  ;;  %v761_v0 = vmov 0.0|0.0   ;;  %vm762_vm0 = vmmov 0   ;;  %v763_v1 = vmov 0.0   ;;  %v29_v2 = vld [vmem:[#allocation2] sm:$0xff] }
  0x13   :  { %632 = vmatprep.subr.bf16.mxu0 %v761_v0  ;;  %524 = vmatprep.mubr.msk.f32.mxu0 %vm762_vm0, %v763_v1  ;;  %v30_v3 = vld [vmem:[#allocation2 + $0x8] sm:$0xff]  ;;  %v31_v4 = vld [vmem:[#allocation2 + $0x10] sm:$0xff]  ;;  %v32_v6 = vld [vmem:[#allocation2 + $0x18] sm:$0xff]  ;;  %vm410_vm1 = vcmask 7168  }
  0x14   :  { %656 = vmatprep.subr.bf16.mxu1 %v761_v0  ;;  %559 = vmatprep.mubr.msk.f32.mxu1 %vm762_vm0, %v763_v1  ;;  %v633_v5 = vpack.c.bf16 %v30_v3, %v29_v2  ;;  %v636_v7 = vpack.c.bf16 %v32_v6, %v31_v4  ;;  %v33_v8 = vld [vmem:[#allocation2 + $0x20] sm:$0xff]  ;;  %v34_v9 = vld [vmem:[#allocation2 + $0x28] sm:$0xff]  ;;  %v126_v12 = vld [vmem:[#allocation2 + $0x90] sm:$0xff] }
  0x15   :  { %v124_v10 = vld [vmem:[#allocation2 + $0x80] sm:$0xff]  ;;  %v125_v11 = vld [vmem:[#allocation2 + $0x88] sm:$0xff]  ;;  %v127_v13 = vld [vmem:[#allocation2 + $0x98] sm:$0xff]  ;;  %v639_v14 = vpack.c.bf16 %v34_v9, %v33_v8 }
  0x16   :  { %634 = vmatpush3.bf16.msra.mxu0 %v633_v5  ;;  %v657_v15 = vpack.c.bf16 %v125_v11, %v124_v10  ;;  %v35_v16 = vld [vmem:[#allocation2 + $0x30] sm:$0xff]  ;;  %v36_v17 = vld [vmem:[#allocation2 + $0x38] sm:$0xff]  ;;  %v660_v18 = vpack.c.bf16 %v127_v13, %v126_v12  ;;  %v128_v19 = vld [vmem:[#allocation2 + $0xa0] sm:$0xff] }
  0x17   :  { %635 = vmatprep.subr.bf16.mxu0 %v761_v0  ;;  %v129_v20 = vld [vmem:[#allocation2 + $0xa8] sm:$0xff]  ;;  %v642_v21 = vpack.c.bf16 %v36_v17, %v35_v16  ;;  %v37_v22 = vld [vmem:[#allocation2 + $0x40] sm:$0xff]  ;;  %v130_v25 = vld [vmem:[#allocation2 + $0xb0] sm:$0xff] }
  0x18   :  { %658 = vmatpush3.bf16.msra.mxu1 %v657_v15  ;;  %v38_v23 = vld [vmem:[#allocation2 + $0x48] sm:$0xff]  ;;  %v663_v24 = vpack.c.bf16 %v129_v20, %v128_v19  ;;  %v131_v26 = vld [vmem:[#allocation2 + $0xb8] sm:$0xff]  ;;  %v39_v28 = vld [vmem:[#allocation2 + $0x50] sm:$0xff] }
  0x19   :  { %659 = vmatprep.subr.bf16.mxu1 %v761_v0  ;;  %v645_v27 = vpack.c.bf16 %v38_v23, %v37_v22  ;;  %v40_v29 = vld [vmem:[#allocation2 + $0x58] sm:$0xff]  ;;  %v666_v30 = vpack.c.bf16 %v131_v26, %v130_v25  ;;  %v132_v31 = vld [vmem:[#allocation2 + $0xc0] sm:$0xff]  ;;  %v133_v32 = vld [vmem:[#allocation2 + $0xc8] sm:$0xff] }
  0x1a   :  { %637 = vmatpush3.bf16.msra.mxu0 %v636_v7  ;;  %v648_v33 = vpack.c.bf16 %v40_v29, %v39_v28  ;;  %v41_v34 = vld [vmem:[#allocation2 + $0x60] sm:$0xff]  ;;  %v42_v35 = vld [vmem:[#allocation2 + $0x68] sm:$0xff]  ;;  %v669_v36 = vpack.c.bf16 %v133_v32, %v132_v31  ;;  %v134_v37 = vld [vmem:[#allocation2 + $0xd0] sm:$0xff] }
  0x1b   :  { %638 = vmatprep.subr.bf16.mxu0 %v761_v0  ;;  %v135_v38 = vld [vmem:[#allocation2 + $0xd8] sm:$0xff]  ;;  %v651_v39 = vpack.c.bf16 %v42_v35, %v41_v34  ;;  %v43_v40 = vld [vmem:[#allocation2 + $0x70] sm:$0xff]  ;;  %v136_v43 = vld [vmem:[#allocation2 + $0xe0] sm:$0xff] }
  0x1c   :  { %661 = vmatpush3.bf16.msra.mxu1 %v660_v18  ;;  %v44_v41 = vld [vmem:[#allocation2 + $0x78] sm:$0xff]  ;;  %v672_v42 = vpack.c.bf16 %v135_v38, %v134_v37  ;;  %v137_v44 = vld [vmem:[#allocation2 + $0xe8] sm:$0xff]  ;;  %v28_v47 = vld [vmem:[%s854_s0] sm:$0xff] }
  0x1d   :  { %662 = vmatprep.subr.bf16.mxu1 %v761_v0  ;;  %v654_v45 = vpack.c.bf16 %v44_v41, %v43_v40  ;;  %v675_v46 = vpack.c.bf16 %v137_v44, %v136_v43  ;;  %v138_v48 = vld [vmem:[#allocation2 + $0xf0] sm:$0xff]  ;;  %v139_v49 = vld [vmem:[#allocation2 + $0xf8] sm:$0xff]  ;;  %v220_v51 = vld [vmem:[#allocation2 + $0x100] sm:$0xff] }
  0x1e   :  { %640 = vmatpush3.bf16.msra.mxu0 %v639_v14  ;;  %v678_v50 = vpack.c.bf16 %v139_v49, %v138_v48  ;;  %v221_v52 = vld [vmem:[#allocation2 + $0x108] sm:$0xff]  ;;  %v222_v53 = vld [vmem:[#allocation2 + $0x110] sm:$0xff]  ;;  %v223_v55 = vld [vmem:[#allocation2 + $0x118] sm:$0xff] }
  0x1f   :  { %641 = vmatprep.subr.bf16.mxu0 %v761_v0  ;;  %v681_v54 = vpack.c.bf16 %v221_v52, %v220_v51  ;;  %v684_v56 = vpack.c.bf16 %v223_v55, %v222_v53  ;;  %v224_v57 = vld [vmem:[#allocation2 + $0x120] sm:$0xff]  ;;  %v225_v58 = vld [vmem:[#allocation2 + $0x128] sm:$0xff]  ;;  %v226_v60 = vld [vmem:[#allocation2 + $0x130] sm:$0xff] }
  0x20   :  { %664 = vmatpush3.bf16.msra.mxu1 %v663_v24  ;;  %v687_v59 = vpack.c.bf16 %v225_v58, %v224_v57  ;;  %v227_v61 = vld [vmem:[#allocation2 + $0x138] sm:$0xff]  ;;  %v228_v63 = vld [vmem:[#allocation2 + $0x140] sm:$0xff]  ;;  %v229_v2 = vld [vmem:[#allocation2 + $0x148] sm:$0xff] }
  0x21   :  { %665 = vmatprep.subr.bf16.mxu1 %v761_v0  ;;  %v690_v62 = vpack.c.bf16 %v227_v61, %v226_v60  ;;  %v693_v3 = vpack.c.bf16 %v229_v2, %v228_v63  ;;  %v230_v4 = vld [vmem:[#allocation2 + $0x150] sm:$0xff]  ;;  %v231_v5 = vld [vmem:[#allocation2 + $0x158] sm:$0xff]  ;;  %v232_v7 = vld [vmem:[#allocation2 + $0x160] sm:$0xff] }
  0x22   :  { %643 = vmatpush3.bf16.msra.mxu0 %v642_v21  ;;  %v696_v6 = vpack.c.bf16 %v231_v5, %v230_v4  ;;  %v233_v8 = vld [vmem:[#allocation2 + $0x168] sm:$0xff]  ;;  %v417_v10 = vld [vmem:[%s856_s2] ss:$0 sm:$0xff]  ;;  %v234_v15 = vld [vmem:[#allocation2 + $0x170] sm:$0xff] }
  0x23   :  { %644 = vmatprep.subr.bf16.mxu0 %v761_v0  ;;  %v699_v9 = vpack.c.bf16 %v233_v8, %v232_v7  ;;  %v235_v16 = vld [vmem:[#allocation2 + $0x178] sm:$0xff]  ;;  %v316_v18 = vld [vmem:[#allocation2 + $0x180] sm:$0xff]  ;;  %v317_v19 = vld [vmem:[#allocation2 + $0x188] sm:$0xff] }
  0x24   :  { %667 = vmatpush3.bf16.msra.mxu1 %v666_v30  ;;  %v702_v17 = vpack.c.bf16 %v235_v16, %v234_v15  ;;  %v318_v20 = vld [vmem:[#allocation2 + $0x190] sm:$0xff]  ;;  %v705_v21 = vpack.c.bf16 %v317_v19, %v316_v18  ;;  %v319_v22 = vld [vmem:[#allocation2 + $0x198] sm:$0xff]  ;;  %v320_v24 = vld [vmem:[#allocation2 + $0x1a0] sm:$0xff] }
  0x25   :  { %668 = vmatprep.subr.bf16.mxu1 %v761_v0  ;;  %v708_v23 = vpack.c.bf16 %v319_v22, %v318_v20  ;;  %v321_v25 = vld [vmem:[#allocation2 + $0x1a8] sm:$0xff]  ;;  %v324_v29 = vld [vmem:[#allocation2 + $0x1c0] sm:$0xff]  ;;  %v326_v32 = vld [vmem:[#allocation2 + $0x1d0] sm:$0xff] }
  0x26   :  { %646 = vmatpush3.bf16.msra.mxu0 %v645_v27  ;;  %v711_v26 = vpack.c.bf16 %v321_v25, %v320_v24  ;;  %v323_v27 = vld [vmem:[#allocation2 + $0x1b8] sm:$0xff]  ;;  %v325_v30 = vld [vmem:[#allocation2 + $0x1c8] sm:$0xff]  ;;  %v328_v35 = vld [vmem:[#allocation2 + $0x1e0] sm:$0xff] }
  0x27   :  { %647 = vmatprep.subr.bf16.mxu0 %v761_v0  ;;  %v717_v31 = vpack.c.bf16 %v325_v30, %v324_v29  ;;  %v419_v38 = vld [vmem:[%s856_s2 + $0x1] ss:$0 sm:$0xff]  ;;  %v330_v43 = vld [vmem:[#allocation2 + $0x1f0] sm:$0xff]  ;;  %v331_v44 = vld [vmem:[#allocation2 + $0x1f8] sm:$0xff] }
  0x28   :  { %670 = vmatpush3.bf16.msra.mxu1 %v669_v36  ;;  %v329_v36 = vld [vmem:[#allocation2 + $0x1e8] sm:$0xff] }
  0x29   :  { %671 = vmatprep.subr.bf16.mxu1 %v761_v0  ;;  %v723_v37 = vpack.c.bf16 %v329_v36, %v328_v35 }
  0x2a   :  { %649 = vmatpush3.bf16.msra.mxu0 %v648_v33  ;;  %v327_v33 = vld [vmem:[#allocation2 + $0x1d8] sm:$0xff] }
  0x2b   :  { %650 = vmatprep.subr.bf16.mxu0 %v761_v0  ;;  %v720_v34 = vpack.c.bf16 %v327_v33, %v326_v32 }
  0x2c   :  { %673 = vmatpush3.bf16.msra.mxu1 %v672_v42 }
  0x2d   :  { %674 = vmatprep.subr.bf16.mxu1 %v761_v0 }
  0x2e   :  { %652 = vmatpush3.bf16.msra.mxu0 %v651_v39 }
  0x2f   :  { %653 = vmatprep.subr.bf16.mxu0 %v761_v0 }
  0x30   :  { %676 = vmatpush3.bf16.msra.mxu1 %v675_v46  ;;  %v421_v46 = vld [vmem:[%s856_s2 + $0x2] ss:$0 sm:$0xff] }
  0x31   :  { %677 = vmatprep.subr.bf16.mxu1 %v761_v0 }
  0x32   :  { %655 = vmatpush3.bf16.msra.mxu0 %v654_v45  ;;  %v726_v45 = vpack.c.bf16 %v331_v44, %v330_v43 }
  0x33   :  { %680 = vmatprep.subr.bf16.mxu0 %v761_v0 }
  0x34   :  { %679 = vmatpush3.bf16.msra.mxu1 %v678_v50  ;;  %v423_v50 = vld [vmem:[%s856_s2 + $0x3] ss:$0 sm:$0xff] }
  0x35   :  { %525 = vmatmul.mubr.f32.vlgmr.msra.gmra.mrb[0].mxu0 %v28_v47  ;;  %704 = vmatprep.subr.bf16.mxu1 %v761_v0 }
  0x36   :  { %594 = vmatprep.mubr.msk.f32.mxu0 %vm762_vm0, %v763_v1  ;;  %682 = vmatpush3.bf16.msra.mxu0 %v681_v54 }
  0x37   :  { %683 = vmatprep.subr.bf16.mxu0 %v761_v0 }
  0x3a   :  { %685 = vmatpush3.bf16.msra.mxu0 %v684_v56 }
  0x3b   :  { %686 = vmatprep.subr.bf16.mxu0 %v761_v0 }
  0x3e   :  { %688 = vmatpush3.bf16.msra.mxu0 %v687_v59 }
  0x3f   :  { %689 = vmatprep.subr.bf16.mxu0 %v761_v0 }
  0x42   :  { %691 = vmatpush3.bf16.msra.mxu0 %v690_v62 }
  0x43   :  { %692 = vmatprep.subr.bf16.mxu0 %v761_v0 }
  0x46   :  { %694 = vmatpush3.bf16.msra.mxu0 %v693_v3 }
  0x47   :  { %695 = vmatprep.subr.bf16.mxu0 %v761_v0 }
  0x4a   :  { %697 = vmatpush3.bf16.msra.mxu0 %v696_v6 }
  0x4b   :  { %698 = vmatprep.subr.bf16.mxu0 %v761_v0 }
  0x4e   :  { %700 = vmatpush3.bf16.msra.mxu0 %v699_v9 }
  0x4f   :  { %701 = vmatprep.subr.bf16.mxu0 %v761_v0 }
  0x52   :  { %703 = vmatpush3.bf16.msra.mxu0 %v702_v17 }
 0x108   :  { %v118_v11 = vpop.f32.mrb[0].mxu0 }
 0x109   :  { %v119_v12 = vadd.f32 %v417_v10, %v118_v11  ;;  %v526_v13 = vpop.f32.mrb[1].mxu0 }
 0x10b   :  { %v122_v14 = vmax.f32 %v119_v12, 0.0 }
 0x10d   :  { %560 = vmatmul.mubr.f32.vlgmr.msra.gmra.mrb[0].mxu1 %v122_v14 }
 0x10e   :  { %629 = vmatprep.mubr.msk.f32.mxu1 %vm762_vm0, %v763_v1  ;;  %706 = vmatpush3.bf16.msra.mxu1 %v705_v21  ;;  %v322_v1 = vld [vmem:[#allocation2 + $0x1b0] sm:$0xff] }
 0x10f   :  { %707 = vmatprep.subr.bf16.mxu1 %v761_v0  ;;  %v714_v28 = vpack.c.bf16 %v323_v27, %v322_v1 }
 0x112   :  { %709 = vmatpush3.bf16.msra.mxu1 %v708_v23 }
 0x113   :  { %710 = vmatprep.subr.bf16.mxu1 %v761_v0 }
 0x116   :  { %712 = vmatpush3.bf16.msra.mxu1 %v711_v26 }
 0x117   :  { %713 = vmatprep.subr.bf16.mxu1 %v761_v0 }
 0x11a   :  { %715 = vmatpush3.bf16.msra.mxu1 %v714_v28 }
 0x11b   :  { %716 = vmatprep.subr.bf16.mxu1 %v761_v0 }
 0x11e   :  { %718 = vmatpush3.bf16.msra.mxu1 %v717_v31 }
 0x11f   :  { %719 = vmatprep.subr.bf16.mxu1 %v761_v0 }
 0x122   :  { %721 = vmatpush3.bf16.msra.mxu1 %v720_v34 }
 0x123   :  { %722 = vmatprep.subr.bf16.mxu1 %v761_v0 }
 0x126   :  { %724 = vmatpush3.bf16.msra.mxu1 %v723_v37 }
 0x127   :  { %725 = vmatprep.subr.bf16.mxu1 %v761_v0 }
 0x12a   :  { %727 = vmatpush3.bf16.msra.mxu1 %v726_v45 }
 0x1e0   :  { %v214_v39 = vpop.f32.mrb[0].mxu1 }
 0x1e1   :  { %v215_v40 = vadd.f32 %v419_v38, %v214_v39  ;;  %v561_v41 = vpop.f32.mrb[1].mxu1 }
 0x1e3   :  { %v218_v42 = vmax.f32 %v215_v40, 0.0 }
 0x1e5   :  { %595 = vmatmul.mubr.f32.vlgmr.msra.gmra.mrb[2].mxu0 %v218_v42 }
 0x2b8   :  { %v310_v47 = vpop.f32.mrb[2].mxu0 }
 0x2b9   :  { %v311_v48 = vadd.f32 %v421_v46, %v310_v47  ;;  %v596_v0 = vpop.f32.mrb[3].mxu0 }
 0x2bb   :  { %v314_v49 = vmax.f32 %v311_v48, 0.0 }
 0x2bd   :  { %630 = vmatmul.mubr.f32.vlgmr.msra.gmra.mrb[2].mxu1 %v314_v49 }
 0x390   :  { %v406_v51 = vpop.f32.mrb[2].mxu1 }
 0x391   :  { %v407_v52 = vadd.f32 %v423_v50, %v406_v51  ;;  %v631_v53 = vpop.f32.mrb[3].mxu1 }
 0x393   :  { %411 = vst.msk [vmem:[%s857_s3] sm:$0xff] %vm410_vm1, %v407_v52 }
 0x394   :  { %416 = vsyncpa [#allocation3], 1 }

</bundles_post_ra>
